<compile_context>
chip_gen: v7x
topology: tpu7x:2x2x1
jax: 0.10.0
libtpu: 0.0.40
codegen_flags: <defaults>
</compile_context>

<pallas_src>
import jax
import jax.numpy as jnp
from jax.experimental import pallas as pl
from jax.experimental.pallas import tpu as pltpu


def _round_up(x, m):
    return ((x + m - 1) // m) * m


def wsgat_kernel(e_ref, z_ref, out_ref, m_sc, l_sc, acc_sc):
    """Flash-style online softmax + weighted sum over word tiles.

    e_ref   : (S_T, W_T)       f32   edge logits (leaky_relu already applied)
    z_ref   : (W_pad, OUT_pad) bf16  resident word projections
    out_ref : (S_T, OUT_pad)   f32   sentence outputs
    """
    f32 = jnp.float32
    wi = pl.program_id(1)
    n_w = pl.num_programs(1)
    w_t = e_ref.shape[1]

    @pl.when(wi == 0)
    def _():
        m_sc[...] = jnp.full_like(m_sc, -jnp.inf)
        l_sc[...] = jnp.zeros_like(l_sc)
        acc_sc[...] = jnp.zeros_like(acc_sc)

    e = e_ref[...]                                                       # (S_T, W_T) f32

    # Online softmax across word tiles.
    m_new = jnp.maximum(m_sc[...], jnp.max(e, axis=-1, keepdims=True))  # (S_T, 1)
    a = jnp.exp(m_sc[...] - m_new)
    p = jnp.exp(e - m_new)                                               # (S_T, W_T)
    l_sc[...] = a * l_sc[...] + jnp.sum(p, axis=-1, keepdims=True)

    # Slice the resident z buffer for this word tile (no per-step z re-DMA).
    w_start = pl.multiple_of(wi * w_t, 128)
    z_blk = z_ref[pl.ds(w_start, w_t), :]                                # (W_T, OUT_pad) bf16
    acc_sc[...] = a * acc_sc[...] + jnp.dot(
        p.astype(jnp.bfloat16), z_blk, preferred_element_type=f32)
    m_sc[...] = m_new

    @pl.when(wi == n_w - 1)
    def _():
        inv_l = pl.reciprocal(l_sc[...], approx=True)
        out_ref[...] = (acc_sc[...] * inv_l).astype(out_ref.dtype)


def wsgat_forward(h_w, tfidf, w_fc, w_feat, w_attn, *, s_tile=None, w_tile=None):
    """word->sentence GAT forward.

    h_w    : (W, in_dim)            word-node features
    tfidf  : (S, W, feat_embed)     per-edge tfidf embeddings (dense bipartite graph)
    w_fc   : (in_dim, out_dim)      fc.weight.T
    w_feat : (feat_embed, out_dim)  feat_fc.weight.T
    w_attn : (3, out_dim)           attn_fc.weight reshaped; rows [a_src, a_dst, a_feat]
    returns: (S, out_dim)
    """
    f32 = jnp.float32
    S, W, F = tfidf.shape
    out_dim = w_fc.shape[1]

    # ---- XLA prologue: fold attention vectors into the weights, build the logits ----
    # a_dst multiplies the destination 'z', which DGL zero-initializes on sentence
    # nodes, so it contributes exactly 0 and is dropped.
    a_src = w_attn[0].astype(f32)                         # (out_dim,)
    a_feat = w_attn[2].astype(f32)                        # (out_dim,)
    z = h_w.astype(f32) @ w_fc.astype(f32)                # (W, out_dim)
    v_feat = w_feat.astype(f32) @ a_feat                  # (F,)
    e_src = z @ a_src                                     # (W,)
    # Full edge logits (S, W): tfidf contraction + source term + leaky_relu (slope 0.01).
    e = jnp.einsum('swf,f->sw', tfidf.astype(f32), v_feat) + e_src[None, :]
    e = jnp.where(e > 0, e, 0.01 * e)

    # ---- tile sizing & padding (lane-dense, VMEM-friendly) --------------------------
    OUT_pad = _round_up(out_dim, 128)                     # lane-dense output slab
    W_T = w_tile or min(2048, _round_up(W, 128))          # word tile (multiple of 128)
    W_pad = _round_up(W, W_T)
    S_T = s_tile or min(128, _round_up(S, 8))             # sentence tile (multiple of 8)
    if s_tile is None and S > 8 and _round_up(S, S_T) // S_T < 2:
        # split sentence work so the "parallel" axis can feed both TensorCores (v7x)
        S_T = max(8, _round_up((S + 1) // 2, 8))
    S_pad = _round_up(S, S_T)

    NEG = jnp.float32(-1e30)
    # Padded word columns get -1e30 logits (softmax mass -> 0); padded sentence rows
    # are sliced off after the call.  This is the only padded copy and it is F x
    # smaller than the tfidf tensor.
    e_p = jnp.full((S_pad, W_pad), NEG, f32).at[:S, :W].set(e)
    z_p = jnp.zeros((W_pad, OUT_pad), jnp.bfloat16).at[:W, :out_dim].set(
        z.astype(jnp.bfloat16))

    grid = (S_pad // S_T, W_pad // W_T)

    out = pl.pallas_call(
        wsgat_kernel,
        out_shape=jax.ShapeDtypeStruct((S_pad, OUT_pad), f32),
        grid_spec=pltpu.PrefetchScalarGridSpec(
            num_scalar_prefetch=0,
            grid=grid,
            in_specs=[
                # streamed logit tile
                pl.BlockSpec((S_T, W_T), lambda si, wi: (si, wi)),
                # z fully resident in VMEM (constant block index -> single DMA)
                pl.BlockSpec((W_pad, OUT_pad), lambda si, wi: (0, 0)),
            ],
            out_specs=pl.BlockSpec((S_T, OUT_pad), lambda si, wi: (si, 0)),
            scratch_shapes=[
                pltpu.VMEM((S_T, 1), f32),        # running max m
                pltpu.VMEM((S_T, 1), f32),        # running denom l
                pltpu.VMEM((S_T, OUT_pad), f32),  # running numerator acc
            ],
        ),
        compiler_params=pltpu.CompilerParams(
            dimension_semantics=("parallel", "arbitrary"),
        ),
    )(e_p, z_p)

    return out[:S, :out_dim]


def wsgat_reference(h_w, tfidf, w_fc, w_feat, w_attn):
    # pure-JAX reference of the same semantics (z_dst == 0)
    z = h_w @ w_fc
    dfeat = jnp.einsum('swf,fo->swo', tfidf, w_feat)
    e = dfeat @ w_attn[2] + (z @ w_attn[0])[None, :]
    e = jnp.where(e > 0, e, 0.01 * e)
    alpha = jax.nn.softmax(e, axis=-1)
    return alpha @ z


if __name__ == "__main__":
    in_dim, out_dim, feat_embed = 32, 32, 16
    W, S = 16, 8   # word nodes, sentence nodes

    key = jax.random.PRNGKey(0)
    k1, k2, k3, k4, k5 = jax.random.split(key, 5)

    # deterministic synthetic inputs / parameters (Linear weights passed transposed)
    h_w = jax.random.normal(k1, (W, in_dim), jnp.float32)
    tfidf = jax.random.normal(k2, (S, W, feat_embed), jnp.float32)
    w_fc = 0.1 * jax.random.normal(k3, (in_dim, out_dim), jnp.float32)        # fc.weight.T
    w_feat = 0.1 * jax.random.normal(k4, (feat_embed, out_dim), jnp.float32)  # feat_fc.weight.T
    w_attn = 0.1 * jax.random.normal(k5, (3, out_dim), jnp.float32)           # attn_fc.weight reshaped

    out = wsgat_forward(h_w, tfidf, w_fc, w_feat, w_attn)
    jax.block_until_ready(out)

    ref = wsgat_reference(h_w, tfidf, w_fc, w_feat, w_attn)
    assert out.shape == (S, out_dim)
    # tolerance covers bf16 z / bf16 probabilities in the MXU matmul + approx reciprocal
    assert jnp.allclose(out, ref, rtol=2e-2, atol=2e-2), "mismatch vs reference"

    print("KERNEL_OK")
</pallas_src>

<mosaic_0001>
module attributes {stable_mosaic.version = 11 : i64} {
  func.func @wsgat_kernel(%arg0: i32, %arg1: i32, %arg2: memref<8x128xf32, #tpu.memory_space<vmem>>, %arg3: memref<128x128xbf16, #tpu.memory_space<vmem>>, %arg4: memref<8x128xf32, #tpu.memory_space<vmem>>, %arg5: memref<8x1xf32, #tpu.memory_space<vmem>>, %arg6: memref<8x1xf32, #tpu.memory_space<vmem>>, %arg7: memref<8x128xf32, #tpu.memory_space<vmem>>) attributes {dimension_semantics = [#tpu.dimension_semantics<parallel>, #tpu.dimension_semantics<arbitrary>], iteration_bounds = array<i64: 1, 1>, scalar_prefetch = 0 : i64, scratch_operands = 3 : i64, tpu.core_type = #tpu.core_type<tc>, window_params = [{transform_indices = @transform_0, window_bounds = array<i64: 8, 128>}, {pipeline_mode = #tpu.pipeline_mode<synchronous>, transform_indices = @transform_1, window_bounds = array<i64: 128, 128>}, {transform_indices = @transform_2, window_bounds = array<i64: 8, 128>}]} {
    %c0_i32 = arith.constant 0 : i32
    %0 = arith.cmpi eq, %arg1, %c0_i32 : i32
    %1 = arith.extui %0 : i1 to i32
    %c0_i32_0 = arith.constant 0 : i32
    %2 = arith.cmpi ne, %1, %c0_i32_0 : i32
    scf.if %2 {
      %cst_21 = arith.constant 0xFF800000 : f32
      %35 = vector.broadcast %cst_21 : f32 to vector<8x1xf32>
      %c0_22 = arith.constant 0 : index
      %c0_23 = arith.constant 0 : index
      %36 = vector.load %arg5[%c0_22, %c0_23] : memref<8x1xf32, #tpu.memory_space<vmem>>, vector<8x1xf32>
      tpu.vector_store %arg5[%c0_22, %c0_23], %35 {strides = array<i32>} : memref<8x1xf32, #tpu.memory_space<vmem>>, vector<8x1xf32>,
      %cst_24 = arith.constant 0.000000e+00 : f32
      %37 = vector.broadcast %cst_24 : f32 to vector<8x1xf32>
      %c0_25 = arith.constant 0 : index
      %c0_26 = arith.constant 0 : index
      %38 = vector.load %arg6[%c0_25, %c0_26] : memref<8x1xf32, #tpu.memory_space<vmem>>, vector<8x1xf32>
      tpu.vector_store %arg6[%c0_25, %c0_26], %37 {strides = array<i32>} : memref<8x1xf32, #tpu.memory_space<vmem>>, vector<8x1xf32>,
      %cst_27 = arith.constant 0.000000e+00 : f32
      %39 = vector.broadcast %cst_27 : f32 to vector<8x128xf32>
      %c0_28 = arith.constant 0 : index
      %c0_29 = arith.constant 0 : index
      %40 = vector.load %arg7[%c0_28, %c0_29] : memref<8x128xf32, #tpu.memory_space<vmem>>, vector<8x128xf32>
      tpu.vector_store %arg7[%c0_28, %c0_29], %39 {strides = array<i32>} : memref<8x128xf32, #tpu.memory_space<vmem>>, vector<8x128xf32>,
    } else {
    }
    %c0 = arith.constant 0 : index
    %c0_1 = arith.constant 0 : index
    %3 = vector.load %arg2[%c0, %c0_1] : memref<8x128xf32, #tpu.memory_space<vmem>>, vector<8x128xf32>
    %c0_2 = arith.constant 0 : index
    %c0_3 = arith.constant 0 : index
    %4 = vector.load %arg5[%c0_2, %c0_3] : memref<8x1xf32, #tpu.memory_space<vmem>>, vector<8x1xf32>
    %cst = arith.constant dense<0xFF800000> : vector<8xf32>
    %5 = vector.multi_reduction <maximumf>, %3, %cst [1] : vector<8x128xf32> to vector<8xf32>
    %6 = vector.shape_cast %5 : vector<8xf32> to vector<8x1xf32>
    %7 = arith.maximumf %4, %6 : vector<8x1xf32>
    %c0_4 = arith.constant 0 : index
    %c0_5 = arith.constant 0 : index
    %8 = vector.load %arg5[%c0_4, %c0_5] : memref<8x1xf32, #tpu.memory_space<vmem>>, vector<8x1xf32>
    %9 = arith.subf %8, %7 : vector<8x1xf32>
    %10 = math.exp %9 : vector<8x1xf32>
    %11 = vector.broadcast %7 : vector<8x1xf32> to vector<8x128xf32>
    %12 = arith.subf %3, %11 : vector<8x128xf32>
    %13 = math.exp %12 : vector<8x128xf32>
    %c0_6 = arith.constant 0 : index
    %c0_7 = arith.constant 0 : index
    %14 = vector.load %arg6[%c0_6, %c0_7] : memref<8x1xf32, #tpu.memory_space<vmem>>, vector<8x1xf32>
    %15 = arith.mulf %10, %14 : vector<8x1xf32>
    %cst_8 = arith.constant dense<0.000000e+00> : vector<8xf32>
    %16 = vector.multi_reduction <add>, %13, %cst_8 [1] : vector<8x128xf32> to vector<8xf32>
    %17 = vector.shape_cast %16 : vector<8xf32> to vector<8x1xf32>
    %18 = arith.addf %15, %17 : vector<8x1xf32>
    %c0_9 = arith.constant 0 : index
    %c0_10 = arith.constant 0 : index
    %19 = vector.load %arg6[%c0_9, %c0_10] : memref<8x1xf32, #tpu.memory_space<vmem>>, vector<8x1xf32>
    tpu.vector_store %arg6[%c0_9, %c0_10], %18 {strides = array<i32>} : memref<8x1xf32, #tpu.memory_space<vmem>>, vector<8x1xf32>,
    %c128_i32 = arith.constant 128 : i32
    %20 = arith.muli %arg1, %c128_i32 : i32
    %21 = tpu.assume_multiple %20, 128 : i32
    %22 = arith.index_cast %21 : i32 to index
    %c0_11 = arith.constant 0 : index
    %23 = vector.load %arg3[%22, %c0_11] : memref<128x128xbf16, #tpu.memory_space<vmem>>, vector<128x128xbf16>
    %c0_12 = arith.constant 0 : index
    %c0_13 = arith.constant 0 : index
    %24 = vector.load %arg7[%c0_12, %c0_13] : memref<8x128xf32, #tpu.memory_space<vmem>>, vector<8x128xf32>
    %25 = vector.broadcast %10 : vector<8x1xf32> to vector<8x128xf32>
    %26 = arith.mulf %25, %24 : vector<8x128xf32>
    %27 = arith.truncf %13 : vector<8x128xf32> to vector<8x128xbf16>
    %cst_14 = arith.constant dense<0.000000e+00> : vector<8x128xf32>
    %28 = tpu.matmul %27, %23, %cst_14 {dimension_numbers = #tpu.dot_dimension_numbers<[1], [0], [0], [1], [0, 0, 1, 1], [], []>} : vector<8x128xbf16>, vector<128x128xbf16>, vector<8x128xf32> -> vector<8x128xf32>
    %29 = arith.addf %26, %28 : vector<8x128xf32>
    %c0_15 = arith.constant 0 : index
    %c0_16 = arith.constant 0 : index
    %30 = vector.load %arg7[%c0_15, %c0_16] : memref<8x128xf32, #tpu.memory_space<vmem>>, vector<8x128xf32>
    tpu.vector_store %arg7[%c0_15, %c0_16], %29 {strides = array<i32>} : memref<8x128xf32, #tpu.memory_space<vmem>>, vector<8x128xf32>,
    %c0_17 = arith.constant 0 : index
    %c0_18 = arith.constant 0 : index
    %31 = vector.load %arg5[%c0_17, %c0_18] : memref<8x1xf32, #tpu.memory_space<vmem>>, vector<8x1xf32>
    tpu.vector_store %arg5[%c0_17, %c0_18], %7 {strides = array<i32>} : memref<8x1xf32, #tpu.memory_space<vmem>>, vector<8x1xf32>,
    %c0_i32_19 = arith.constant 0 : i32
    %32 = arith.cmpi eq, %arg1, %c0_i32_19 : i32
    %33 = arith.extui %32 : i1 to i32
    %c0_i32_20 = arith.constant 0 : i32
    %34 = arith.cmpi ne, %33, %c0_i32_20 : i32
    scf.if %34 {
      %c0_21 = arith.constant 0 : index
      %c0_22 = arith.constant 0 : index
      %35 = vector.load %arg6[%c0_21, %c0_22] : memref<8x1xf32, #tpu.memory_space<vmem>>, vector<8x1xf32>
      %36 = tpu.reciprocal %35 {approx = true} : vector<8x1xf32> -> vector<8x1xf32>
      %c0_23 = arith.constant 0 : index
      %c0_24 = arith.constant 0 : index
      %37 = vector.load %arg7[%c0_23, %c0_24] : memref<8x128xf32, #tpu.memory_space<vmem>>, vector<8x128xf32>
      %38 = vector.broadcast %36 : vector<8x1xf32> to vector<8x128xf32>
      %39 = arith.mulf %37, %38 : vector<8x128xf32>
      %c0_25 = arith.constant 0 : index
      %c0_26 = arith.constant 0 : index
      %40 = vector.load %arg4[%c0_25, %c0_26] : memref<8x128xf32, #tpu.memory_space<vmem>>, vector<8x128xf32>
      tpu.vector_store %arg4[%c0_25, %c0_26], %39 {strides = array<i32>} : memref<8x128xf32, #tpu.memory_space<vmem>>, vector<8x128xf32>,
    } else {
    }
    return
  }
  func.func @transform_0(%arg0: i32, %arg1: i32) -> (i32, i32) {
    %c0_i32 = arith.constant 0 : i32
    return %arg0, %arg1 : i32, i32
  }
  func.func @transform_1(%arg0: i32, %arg1: i32) -> (i32, i32) {
    %c0_i32 = arith.constant 0 : i32
    %c0_i32_0 = arith.constant 0 : i32
    %c0_i32_1 = arith.constant 0 : i32
    return %c0_i32, %c0_i32_0 : i32, i32
  }
  func.func @transform_2(%arg0: i32, %arg1: i32) -> (i32, i32) {
    %c0_i32 = arith.constant 0 : i32
    %c0_i32_0 = arith.constant 0 : i32
    return %arg0, %c0_i32 : i32, i32
  }
}

</mosaic_0001>

<bundles_post_ra>
// kernel: tpu_custom_call.1
= control target key start
LH: loop header
LB: loop body
LE: loop exit
PB: predicated region body
PF: predicated region fallthrough
CT: control target
= control target key end

     0   :  { %7 = vsyncpa [#allocation6], 0  ;;  %s426_s0 = inlined_call_operand.hbm [shape: f32[8,128], index: 0, kind: input, shape index: {}]   ;;  %s427_s1 = inlined_call_operand.hbm [shape: bf16[128,128], index: 1, kind: input, shape index: {}]   ;;  %s428_s2 = inlined_call_operand.hbm [shape: f32[8,128], index: 2, kind: output, shape index: {}]  }
   0x1   :  { %8 = vsyncpa [#allocation9], 0 }
   0x2   :  { %9 = vsyncpa [#allocation7], 0  ;;  %s355_s9 = smov [#allocation5]   ;;  %s356_s11 = smov [#allocation8]  }
   0x3   :  { %s16_s10 = sshll.u32 %s355_s9, 4  ;;  %s25_s12 = sshll.u32 %s356_s11, 4  ;;  %s17_s10 = int_to_ptr.vmem [resolvable:$true] %s16_s10  ;;  %s379_s12 = int_to_ptr.vmem [resolvable:$true] %s25_s12 }
   0x4   :  { %s283_s15 = scalar_lea.hbm %s426_s0, 128 }
   0x5   :  { %p284_p0 = scmp.ne.s32.totalorder %s426_s0, %s283_s15  ;;  %p287_p1 = scmp.lt.u32.totalorder %s283_s15, %s426_s0 }
   0x7   :  { %p289_p2 = pnand %p287_p1, %p284_p0 }
   0x9   :  { %292 = shalt.err (!%p289_p2)
}
   0xa   :  { %s293_s20 = scalar_lea.vmem %s17_s10, 128  ;;  %p298_p4 = scmp.lt.s32.totalorder %s17_s10, %s17_s10 }
   0xb   :  { %p294_p3 = scmp.ne.s32.totalorder %s17_s10, %s293_s20  ;;  %p299_p5 = scmp.lt.s32.totalorder %s293_s20, %s293_s20 }
   0xd   :  { %p300_p6 = por %p299_p5, %p298_p4 }
   0xf   :  { %p301_p7 = pnand %p300_p6, %p294_p3 }
  0x11   :  { %304 = shalt.err (!%p301_p7)
}
  0x12   :  { %19 = dma.hbm_to_vmem [thread:$0]  %s426_s0, 128, %s17_s10, [#allocation6]  }
  0x13   :  { %s305_s25 = scalar_lea.hbm %s427_s1, 1024 }
  0x14   :  { %p306_p8 = scmp.ne.s32.totalorder %s427_s1, %s305_s25  ;;  %p309_p9 = scmp.lt.u32.totalorder %s305_s25, %s427_s1 }
  0x16   :  { %p311_p10 = pnand %p309_p9, %p306_p8 }
  0x18   :  { %314 = shalt.err (!%p311_p10)
}
  0x19   :  { %s315_s30 = scalar_lea.vmem %s379_s12, 1024  ;;  %p320_p12 = scmp.lt.s32.totalorder %s379_s12, %s379_s12 }
  0x1a   :  { %p316_p11 = scmp.ne.s32.totalorder %s379_s12, %s315_s30  ;;  %p321_p13 = scmp.lt.s32.totalorder %s315_s30, %s315_s30 }
  0x1c   :  { %p322_p0 = por %p321_p13, %p320_p12 }
  0x1e   :  { %p323_p1 = pnand %p322_p0, %p316_p11 }
  0x20   :  { %326 = shalt.err (!%p323_p1)
}
  0x21   :  { %s357_s0 = smov 64   ;;  %s358_s3 = smov 4  }
  0x22   :  { %31 = dma.hbm_to_vmem [thread:$0]  %s427_s1, 1024, %s379_s12, [#allocation9], %s357_s0, %s357_s0, %s358_s3  }
  0x23   :  { %349 = dma.done.wait [#allocation6], 128  }
  0x24   :  { %350 = vsyncadd [#allocation6], 4294967168 }
  0x25   :  { %351 = dma.done.wait [#allocation9], 1024  }
  0x26   :  { %352 = vsyncadd [#allocation9], 4294966272  ;;  %vm43_vm0 = vcmask 7168   ;;  %v359_v0 = vmov -inf   ;;  %v47_v1 = vld [vmem:[#allocation5] sm:$0xff]  ;;  %v360_v2 = vmov 0  }
  0x27   :  { %44 = vst.msk [vmem:[#allocation2] sm:$0xff] %vm43_vm0, %v359_v0  ;;  %49 = vmax.xlane.f32.xlu0 %v47_v1  ;;  %268 = vset.pattern.permute.xlu1 %v360_v2  ;;  %v269_v3 = vld [vmem:[#allocation8] sm:$0xff]   ;;  %v361_v4 = vmov 0.0   ;;  %v270_v5 = vld [vmem:[#allocation8 + $0x8] sm:$0xff]   ;;  %v271_v6 = vld [vmem:[#allocation8 + $0x10] sm:$0xff]   ;;  %vm362_vm1 = vmmov 0  }
  0x28   :  { %267 = vset.pattern.permute.xlu0 %v360_v2  ;;  %238 = vmatprep.subr.bf16.mxu0 %v361_v4  ;;  %45 = vst.msk [vmem:[#allocation3] sm:$0xff] %vm43_vm0, %v361_v4  ;;  %v272_v7 = vld [vmem:[#allocation8 + $0x18] sm:$0xff]   ;;  %v273_v12 = vld [vmem:[#allocation8 + $0x20] sm:$0xff]   ;;  %v274_v13 = vld [vmem:[#allocation8 + $0x28] sm:$0xff]   ;;  %s363_s1 = smov [#allocation10]  }
  0x29   :  { %239 = vmatpush3.bf16.msra.mxu0 %v269_v3  ;;  %v275_v14 = vld [vmem:[#allocation8 + $0x30] sm:$0xff]   ;;  %v276_v15 = vld [vmem:[#allocation8 + $0x38] sm:$0xff]   ;;  %254 = vmatprep.mubr.msk.bf16.mxu0 %vm362_vm1, %v361_v4  ;;  %s209_s6 = sshll.u32 %s363_s1, 4  ;;  %s210_s6 = int_to_ptr.vmem [resolvable:$true] %s209_s6 }
  0x2a   :  { %240 = vmatprep.subr.bf16.mxu0 %v361_v4  ;;  %s327_s7 = scalar_lea.vmem %s210_s6, 128  ;;  %p332_p3 = scmp.lt.s32.totalorder %s210_s6, %s210_s6 }
  0x2b   :  { %p328_p2 = scmp.ne.s32.totalorder %s210_s6, %s327_s7  ;;  %p333_p4 = scmp.lt.s32.totalorder %s327_s7, %s327_s7 }
  0x2d   :  { %241 = vmatpush3.bf16.msra.mxu0 %v270_v5  ;;  %p334_p5 = por %p333_p4, %p332_p3 }
  0x2e   :  { %242 = vmatprep.subr.bf16.mxu0 %v361_v4  ;;  %v48_v8 = vld [vmem:[#allocation2] sm:$0xff] }
  0x2f   :  { %v63_v23 = vld [vmem:[#allocation3] sm:$0xff]  ;;  %p335_p6 = pnand %p334_p5, %p328_p2 }
  0x31   :  { %243 = vmatpush3.bf16.msra.mxu0 %v271_v6 }
  0x32   :  { %244 = vmatprep.subr.bf16.mxu0 %v361_v4 }
  0x35   :  { %245 = vmatpush3.bf16.msra.mxu0 %v272_v7 }
  0x36   :  { %246 = vmatprep.subr.bf16.mxu0 %v361_v4 }
  0x39   :  { %247 = vmatpush3.bf16.msra.mxu0 %v273_v12 }
  0x3a   :  { %248 = vmatprep.subr.bf16.mxu0 %v361_v4 }
  0x3d   :  { %249 = vmatpush3.bf16.msra.mxu0 %v274_v13 }
  0x3e   :  { %250 = vmatprep.subr.bf16.mxu0 %v361_v4 }
  0x41   :  { %251 = vmatpush3.bf16.msra.mxu0 %v275_v14 }
  0x42   :  { %252 = vmatprep.subr.bf16.mxu0 %v361_v4 }
  0x45   :  { %253 = vmatpush3.bf16.msra.mxu0 %v276_v15 }
  0xb4   :  { %v50_v9 = vpop.xlane.xlu0 %49 }
  0xb5   :  { %v51_v10 = vmax.f32 %v48_v8, %v50_v9 }
  0xb7   :  { %v52_v11 = vsub.f32 %v48_v8, %v51_v10  ;;  %189 = vst.msk [vmem:[#allocation2] sm:$0xff] %vm43_vm0, %v51_v10  ;;  %57 = vperm.xlu0 %267, %v51_v10  }
  0xb9   :  { %v53_v21 = vmul.f32 1.442695, %v52_v11 }
 0x136   :  { %v58_v16 = vpop.permute.xlu0 %57 }
 0x137   :  { %v60_v17 = vsub.f32 %v47_v1, %v58_v16 }
 0x139   :  { %v61_v18 = vmul.f32 1.442695, %v60_v17 }
 0x13b   :  { %277 = vpow2.f32 %v61_v18 }
 0x13c   :  { %279 = vpow2.f32 %v53_v21 }
 0x145   :  { %v278_v19 = vpop.eup %277 }
 0x146   :  { %65 = vadd.xlane.f32.xlu1 %v278_v19  ;;  %v98_v20 = vpack.c.bf16 %v278_v19, %v278_v19  ;;  %v280_v22 = vpop.eup %279 }
 0x147   :  { %v64_v24 = vmul.f32 %v280_v22, %v63_v23 }
 0x148   :  { %255 = vmatmul.mubr.bf16.vlgmr.msra.gmra.mrb[0].mxu0 %v98_v20 }
 0x157   :  { %94 = vperm.xlu1 %268, %v280_v22  }
 0x1d3   :  { %v66_v25 = vpop.xlane.xlu1 %65 }
 0x1d4   :  { %v67_v26 = vadd.f32 %v66_v25, %v64_v24 }
 0x1d6   :  { %69 = vst.msk [vmem:[#allocation3] sm:$0xff] %vm43_vm0, %v67_v26 }
 0x1d7   :  { %v95_v33 = vpop.permute.xlu1 %94 }
 0x1d8   :  { %v97_v34 = vmul.f32 0.0, %v95_v33 }
 0x1dd   :  { %v193_v27 = vld [vmem:[#allocation3] sm:$0xff] }
 0x1de   :  { %281 = vrcp.f32 %v193_v27 }
 0x1e8   :  { %v282_v28 = vpop.eup %281 }
 0x1e9   :  { %198 = vperm.xlu1 %268, %v282_v28  }
 0x21b   :  { %v181_v29 = vpop.f32.mrb[0].mxu0 }
 0x21c   :  { %v256_v30 = vpop.f32.mrb[1].mxu0  ;;  %v187_v35 = vadd.f32 %v181_v29, %v97_v34 }
 0x21d   :  { %v184_v31 = vpop.f32.mrb[2].mxu0 }
 0x21e   :  { %v257_v32 = vpop.f32.mrb[3].mxu0 }
 0x268   :  { %v199_v36 = vpop.permute.xlu1 %198 }
 0x269   :  { %v201_v37 = vmul.f32 %v199_v36, %v187_v35 }
 0x26b   :  { %202 = vst [vmem:[#allocation10] sm:$0xff] %v201_v37 }
 0x26c   :  { %338 = shalt.err (!%p335_p6)
}
 0x26d   :  { %s339_s10 = scalar_lea.hbm %s428_s2, 128 }
 0x26e   :  { %p340_p7 = scmp.ne.s32.totalorder %s428_s2, %s339_s10  ;;  %p343_p8 = scmp.lt.u32.totalorder %s339_s10, %s428_s2 }
 0x270   :  { %p345_p9 = pnand %p343_p8, %p340_p7 }
 0x272   :  { %348 = shalt.err (!%p345_p9)
}
 0x273   :  { %212 = dma.vmem_to_hbm [thread:$0]  %s210_s6, 128, %s428_s2, [#allocation7]  }
 0x274   :  { %353 = dma.done.wait [#allocation7], 128  }
 0x275   :  { %354 = vsyncadd [#allocation7], 4294967168 }
 0x276   :  { %216 = vsyncpa [#allocation6], 1 }
 0x277   :  { %217 = vsyncpa [#allocation9], 1 }
 0x278   :  { %218 = vsyncpa [#allocation7], 1 }

</bundles_post_ra>
